<compile_context>
chip_gen: v7x
topology: tpu7x:2x2x1
jax: 0.10.0
libtpu: 0.0.40
codegen_flags: <defaults>
</compile_context>

<pallas_src>
import jax
import jax.numpy as jnp
from jax.experimental import pallas as pl
from jax.experimental.pallas import tpu as pltpu


def _round_up(x, m):
    return ((x + m - 1) // m) * m


def _vmem_capacity_bytes():
    try:
        return int(pltpu.get_tpu_info().vmem_capacity_bytes)
    except Exception:
        return 64 * 1024 * 1024  # conservative fallback (v7x per-TC VMEM)


# ---------------- kernel bodies ----------------

def _ffn_fused_kernel(x_ref, w1_ref, b1_ref, w2_ref, b2_ref, o_ref):
    # Whole hidden dim resident: one dot pair, no reduction axis, no branches.
    h = jnp.dot(x_ref[...].astype(w1_ref.dtype), w1_ref[...],
                preferred_element_type=jnp.float32)
    h = jnp.maximum(h + b1_ref[...], 0.0)
    out = jnp.dot(h.astype(w2_ref.dtype), w2_ref[...],
                  preferred_element_type=jnp.float32)
    o_ref[...] = (out + b2_ref[...]).astype(o_ref.dtype)


def _ffn_tiled_kernel_f32out(x_ref, w1_ref, b1_ref, w2_ref, b2_ref, o_ref):
    # H tiled (trailing "arbitrary" grid axis); accumulate directly into the
    # resident f32 output block: no scratch, no zero-init store/reload.
    j = pl.program_id(1)
    h = jnp.dot(x_ref[...].astype(w1_ref.dtype), w1_ref[...],
                preferred_element_type=jnp.float32)
    h = jnp.maximum(h + b1_ref[...], 0.0)
    contrib = jnp.dot(h.astype(w2_ref.dtype), w2_ref[...],
                      preferred_element_type=jnp.float32)

    @pl.when(j == 0)
    def _():
        o_ref[...] = contrib

    @pl.when(j > 0)
    def _():
        o_ref[...] = o_ref[...] + contrib

    @pl.when(j == pl.num_programs(1) - 1)
    def _():
        o_ref[...] = o_ref[...] + b2_ref[...]


def _ffn_tiled_kernel_scratch(x_ref, w1_ref, b1_ref, w2_ref, b2_ref, o_ref,
                              acc_ref):
    # Narrow output dtypes: keep an f32 accumulator, cast once at the end.
    j = pl.program_id(1)
    h = jnp.dot(x_ref[...].astype(w1_ref.dtype), w1_ref[...],
                preferred_element_type=jnp.float32)
    h = jnp.maximum(h + b1_ref[...], 0.0)
    contrib = jnp.dot(h.astype(w2_ref.dtype), w2_ref[...],
                      preferred_element_type=jnp.float32)

    @pl.when(j == 0)
    def _():
        acc_ref[...] = contrib

    @pl.when(j > 0)
    def _():
        acc_ref[...] += contrib

    @pl.when(j == pl.num_programs(1) - 1)
    def _():
        o_ref[...] = (acc_ref[...] + b2_ref[...]).astype(o_ref.dtype)


# ---------------- wrapper ----------------

def feed_forward(x, w1, b1, w2, b2, *, tm=512, th=2048,
                 compute_dtype=jnp.bfloat16, force_tiled=False):
    """FeedForward: relu(x @ w1 + b1) @ w2 + b2.

    x: (B, T, E); w1: (E, 4E); b1: (4E,); w2: (4E, E); b2: (E,).
    Matmuls run with `compute_dtype` operands and f32 MXU accumulation; the
    returned array matches x.dtype.
    """
    B, T, E = x.shape
    H = w1.shape[1]
    M = B * T
    out_dtype = x.dtype

    compute_dtype = jnp.dtype(compute_dtype)
    E_p = _round_up(E, 128)
    H_128 = _round_up(H, 128)

    # Row tile: multiple of 32 so bf16/int8 operand packing stays legal.
    tm = max(32, min(tm, _round_up(M, 32)))
    th = max(128, min(th, H_128))

    xb = compute_dtype.itemsize
    wb = compute_dtype.itemsize
    ob = jnp.dtype(out_dtype).itemsize

    vmem_cap = _vmem_capacity_bytes()
    vmem_budget = int(vmem_cap * 0.85)

    # ---- fast path: full weight set resident in VMEM, no H reduction axis ----
    fast_bytes = (2 * (tm * E_p * xb + tm * E_p * ob)              # x / out blocks
                  + 2 * (E_p * H_128 * wb + H_128 * E_p * wb)      # W1, W2
                  + 8 * H_128 * 4 + 8 * E_p * 4                    # biases
                  + tm * H_128 * 4 + tm * E_p * 4)                 # f32 intermediates
    use_fast = (not force_tiled) and fast_bytes <= vmem_cap // 2

    use_scratch = False
    if use_fast:
        H_p = H_128
        grid_h = 1
        tile_bytes = fast_bytes
    else:
        # ---- tiled path: shrink th (then tm) until the tile set fits VMEM ----
        use_scratch = out_dtype != jnp.float32
        while True:
            tile_bytes = (2 * (tm * E_p * xb        # x block
                               + E_p * th * wb      # W1 H-tile
                               + 8 * th * 4         # b1 H-tile
                               + th * E_p * wb      # W2 H-tile
                               + 8 * E_p * 4        # b2
                               + tm * E_p * ob)     # out block
                          + tm * th * 4             # f32 intermediate h
                          + (tm * E_p * 4 if use_scratch else 0))
            if tile_bytes <= vmem_budget or (th <= 128 and tm <= 64):
                break
            if th > 128:
                th //= 2
            else:
                tm //= 2
        H_p = _round_up(H, th)
        grid_h = H_p // th

    M_p = _round_up(M, tm)
    n_row_tiles = M_p // tm

    # ---- pad to lane-dense, tile-aligned shapes (extra lanes contribute 0) ----
    xd = x.reshape(M, E).astype(compute_dtype)
    xd = jnp.pad(xd, ((0, M_p - M), (0, E_p - E)))
    w1p = jnp.pad(w1, ((0, E_p - E), (0, H_p - H))).astype(compute_dtype)
    b1p = jnp.pad(b1, (0, H_p - H)).reshape(1, H_p).astype(jnp.float32)
    w2p = jnp.pad(w2, ((0, H_p - H), (0, E_p - E))).astype(compute_dtype)
    b2p = jnp.pad(b2, (0, E_p - E)).reshape(1, E_p).astype(jnp.float32)

    vmem_limit = int(min(vmem_cap, max(tile_bytes + (8 << 20), 32 << 20)))

    # Weights are re-streamed from HBM once per row tile on the tiled path.
    weight_reads = 1 if use_fast else n_row_tiles
    cost = pl.CostEstimate(
        flops=4 * M_p * E_p * H_p,
        transcendentals=0,
        bytes_accessed=int(M_p * E_p * xb + M_p * E_p * ob
                           + weight_reads * (w1p.size + w2p.size) * wb
                           + b1p.size * 4 + b2p.size * 4),
    )

    if use_fast:
        out = pl.pallas_call(
            _ffn_fused_kernel,
            out_shape=jax.ShapeDtypeStruct((M_p, E_p), out_dtype),
            grid_spec=pltpu.PrefetchScalarGridSpec(
                num_scalar_prefetch=0,
                grid=(n_row_tiles,),
                in_specs=[
                    pl.BlockSpec((tm, E_p), lambda i: (i, 0)),    # x rows
                    pl.BlockSpec((E_p, H_p), lambda i: (0, 0)),   # W1 (resident)
                    pl.BlockSpec((1, H_p), lambda i: (0, 0)),     # b1
                    pl.BlockSpec((H_p, E_p), lambda i: (0, 0)),   # W2 (resident)
                    pl.BlockSpec((1, E_p), lambda i: (0, 0)),     # b2
                ],
                out_specs=pl.BlockSpec((tm, E_p), lambda i: (i, 0)),
            ),
            compiler_params=pltpu.CompilerParams(
                dimension_semantics=("parallel",),
                vmem_limit_bytes=vmem_limit),
            cost_estimate=cost,
        )(xd, w1p, b1p, w2p, b2p)
    else:
        kernel = (_ffn_tiled_kernel_scratch if use_scratch
                  else _ffn_tiled_kernel_f32out)
        scratch = [pltpu.VMEM((tm, E_p), jnp.float32)] if use_scratch else []
        out = pl.pallas_call(
            kernel,
            out_shape=jax.ShapeDtypeStruct((M_p, E_p), out_dtype),
            grid_spec=pltpu.PrefetchScalarGridSpec(
                num_scalar_prefetch=0,
                grid=(n_row_tiles, grid_h),            # reduction axis trailing
                in_specs=[
                    pl.BlockSpec((tm, E_p), lambda i, j: (i, 0)),   # x rows
                    pl.BlockSpec((E_p, th), lambda i, j: (0, j)),   # W1 H-tile
                    pl.BlockSpec((1, th), lambda i, j: (0, j)),     # b1 H-tile
                    pl.BlockSpec((th, E_p), lambda i, j: (j, 0)),   # W2 H-tile
                    pl.BlockSpec((1, E_p), lambda i, j: (0, 0)),    # b2
                ],
                out_specs=pl.BlockSpec((tm, E_p), lambda i, j: (i, 0)),
                scratch_shapes=scratch,
            ),
            compiler_params=pltpu.CompilerParams(
                dimension_semantics=("parallel", "arbitrary"),
                vmem_limit_bytes=vmem_limit),
            cost_estimate=cost,
        )(xd, w1p, b1p, w2p, b2p)

    return out[:M, :E].reshape(B, T, E)


def reference(x, w1, b1, w2, b2):
    h = jnp.maximum(x.astype(jnp.float32) @ w1 + b1, 0.0)
    return h @ w2 + b2


if __name__ == "__main__":
    B, T, E = 2, 8, 64
    H = 4 * E

    key = jax.random.PRNGKey(0)
    kx, kw1, kb1, kw2, kb2 = jax.random.split(key, 5)

    # Deterministic init mimicking PyTorch nn.Linear default: U(-1/sqrt(fan_in), 1/sqrt(fan_in)).
    lim1 = 1.0 / jnp.sqrt(E)
    lim2 = 1.0 / jnp.sqrt(H)
    x = jax.random.normal(kx, (B, T, E), dtype=jnp.float32)
    w1 = jax.random.uniform(kw1, (E, H), jnp.float32, -lim1, lim1)
    b1 = jax.random.uniform(kb1, (H,), jnp.float32, -lim1, lim1)
    w2 = jax.random.uniform(kw2, (H, E), jnp.float32, -lim2, lim2)
    b2 = jax.random.uniform(kb2, (E,), jnp.float32, -lim2, lim2)

    y_ref = reference(x, w1, b1, w2, b2)

    # 1) Default path: bf16 operands + f32 accumulation, fused (weights resident).
    y_bf16 = jax.block_until_ready(feed_forward(x, w1, b1, w2, b2))
    assert y_bf16.shape == (B, T, E)
    assert jnp.allclose(y_bf16.astype(jnp.float32), y_ref, atol=3e-2, rtol=3e-2), \
        "bf16 fast path mismatch vs reference"

    # 2) Exact f32 numerics through the tiled (H-reduction) kernel that
    #    accumulates directly into the f32 output block (no scratch).
    y_f32 = jax.block_until_ready(
        feed_forward(x, w1, b1, w2, b2, compute_dtype=jnp.float32,
                     force_tiled=True, th=128))
    assert jnp.allclose(y_f32, y_ref, atol=1e-4, rtol=1e-4), \
        "f32 tiled path mismatch vs reference"

    # 3) Narrow (bf16) output dtype exercises the scratch-accumulator variant.
    y_nb = jax.block_until_ready(
        feed_forward(x.astype(jnp.bfloat16), w1, b1, w2, b2,
                     force_tiled=True, th=128))
    assert y_nb.dtype == jnp.bfloat16
    assert jnp.allclose(y_nb.astype(jnp.float32), y_ref, atol=5e-2, rtol=5e-2), \
        "bf16-out tiled path mismatch vs reference"

    print("KERNEL_OK")
</pallas_src>

<mosaic_0001>
module attributes {stable_mosaic.version = 11 : i64} {
  func.func @_ffn_fused_kernel(%arg0: i32, %arg1: memref<32x128xbf16, #tpu.memory_space<vmem>>, %arg2: memref<128x256xbf16, #tpu.memory_space<vmem>>, %arg3: memref<1x256xf32, #tpu.memory_space<vmem>>, %arg4: memref<256x128xbf16, #tpu.memory_space<vmem>>, %arg5: memref<1x128xf32, #tpu.memory_space<vmem>>, %arg6: memref<32x128xf32, #tpu.memory_space<vmem>>) attributes {dimension_semantics = [#tpu.dimension_semantics<parallel>], iteration_bounds = array<i64: 1>, scalar_prefetch = 0 : i64, scratch_operands = 0 : i64, tpu.core_type = #tpu.core_type<tc>, window_params = [{transform_indices = @transform_0, window_bounds = array<i64: 32, 128>}, {pipeline_mode = #tpu.pipeline_mode<synchronous>, transform_indices = @transform_1, window_bounds = array<i64: 128, 256>}, {pipeline_mode = #tpu.pipeline_mode<synchronous>, transform_indices = @transform_2, window_bounds = array<i64: 1, 256>}, {pipeline_mode = #tpu.pipeline_mode<synchronous>, transform_indices = @transform_3, window_bounds = array<i64: 256, 128>}, {pipeline_mode = #tpu.pipeline_mode<synchronous>, transform_indices = @transform_4, window_bounds = array<i64: 1, 128>}, {transform_indices = @transform_5, window_bounds = array<i64: 32, 128>}]} {
    %c0 = arith.constant 0 : index
    %c0_0 = arith.constant 0 : index
    %0 = vector.load %arg1[%c0, %c0_0] : memref<32x128xbf16, #tpu.memory_space<vmem>>, vector<32x128xbf16>
    %c0_1 = arith.constant 0 : index
    %c0_2 = arith.constant 0 : index
    %1 = vector.load %arg2[%c0_1, %c0_2] : memref<128x256xbf16, #tpu.memory_space<vmem>>, vector<128x256xbf16>
    %cst = arith.constant dense<0.000000e+00> : vector<32x256xf32>
    %2 = tpu.matmul %0, %1, %cst {dimension_numbers = #tpu.dot_dimension_numbers<[1], [0], [0], [1], [0, 0, 1, 1], [], []>} : vector<32x128xbf16>, vector<128x256xbf16>, vector<32x256xf32> -> vector<32x256xf32>
    %c0_3 = arith.constant 0 : index
    %c0_4 = arith.constant 0 : index
    %3 = vector.load %arg3[%c0_3, %c0_4] : memref<1x256xf32, #tpu.memory_space<vmem>>, vector<1x256xf32>
    %4 = vector.broadcast %3 : vector<1x256xf32> to vector<32x256xf32>
    %5 = arith.addf %2, %4 : vector<32x256xf32>
    %cst_5 = arith.constant 0.000000e+00 : f32
    %6 = vector.broadcast %cst_5 : f32 to vector<32x256xf32>
    %7 = arith.maximumf %5, %6 : vector<32x256xf32>
    %8 = arith.truncf %7 : vector<32x256xf32> to vector<32x256xbf16>
    %c0_6 = arith.constant 0 : index
    %c0_7 = arith.constant 0 : index
    %9 = vector.load %arg4[%c0_6, %c0_7] : memref<256x128xbf16, #tpu.memory_space<vmem>>, vector<256x128xbf16>
    %cst_8 = arith.constant dense<0.000000e+00> : vector<32x128xf32>
    %10 = tpu.matmul %8, %9, %cst_8 {dimension_numbers = #tpu.dot_dimension_numbers<[1], [0], [0], [1], [0, 0, 1, 1], [], []>} : vector<32x256xbf16>, vector<256x128xbf16>, vector<32x128xf32> -> vector<32x128xf32>
    %c0_9 = arith.constant 0 : index
    %c0_10 = arith.constant 0 : index
    %11 = vector.load %arg5[%c0_9, %c0_10] : memref<1x128xf32, #tpu.memory_space<vmem>>, vector<1x128xf32>
    %12 = vector.broadcast %11 : vector<1x128xf32> to vector<32x128xf32>
    %13 = arith.addf %10, %12 : vector<32x128xf32>
    %c0_11 = arith.constant 0 : index
    %c0_12 = arith.constant 0 : index
    %14 = vector.load %arg6[%c0_11, %c0_12] : memref<32x128xf32, #tpu.memory_space<vmem>>, vector<32x128xf32>
    tpu.vector_store %arg6[%c0_11, %c0_12], %13 {strides = array<i32>} : memref<32x128xf32, #tpu.memory_space<vmem>>, vector<32x128xf32>,
    return
  }
  func.func @transform_0(%arg0: i32) -> (i32, i32) {
    %c0_i32 = arith.constant 0 : i32
    %c0_i32_0 = arith.constant 0 : i32
    return %arg0, %c0_i32 : i32, i32
  }
  func.func @transform_1(%arg0: i32) -> (i32, i32) {
    %c0_i32 = arith.constant 0 : i32
    %c0_i32_0 = arith.constant 0 : i32
    %c0_i32_1 = arith.constant 0 : i32
    return %c0_i32, %c0_i32_0 : i32, i32
  }
  func.func @transform_2(%arg0: i32) -> (i32, i32) {
    %c0_i32 = arith.constant 0 : i32
    %c0_i32_0 = arith.constant 0 : i32
    %c0_i32_1 = arith.constant 0 : i32
    return %c0_i32, %c0_i32_0 : i32, i32
  }
  func.func @transform_3(%arg0: i32) -> (i32, i32) {
    %c0_i32 = arith.constant 0 : i32
    %c0_i32_0 = arith.constant 0 : i32
    %c0_i32_1 = arith.constant 0 : i32
    return %c0_i32, %c0_i32_0 : i32, i32
  }
  func.func @transform_4(%arg0: i32) -> (i32, i32) {
    %c0_i32 = arith.constant 0 : i32
    %c0_i32_0 = arith.constant 0 : i32
    %c0_i32_1 = arith.constant 0 : i32
    return %c0_i32, %c0_i32_0 : i32, i32
  }
  func.func @transform_5(%arg0: i32) -> (i32, i32) {
    %c0_i32 = arith.constant 0 : i32
    %c0_i32_0 = arith.constant 0 : i32
    return %arg0, %c0_i32 : i32, i32
  }
}

</mosaic_0001>

<bundles_post_ra>
// kernel: tpu_custom_call.1
= control target key start
LH: loop header
LB: loop body
LE: loop exit
PB: predicated region body
PF: predicated region fallthrough
CT: control target
= control target key end

     0   :  { %10 = vsyncpa [#allocation3], 0  ;;  %s765_s0 = inlined_call_operand.hbm [shape: bf16[32,128], index: 0, kind: input, shape index: {}]   ;;  %s766_s1 = inlined_call_operand.hbm [shape: bf16[128,256], index: 1, kind: input, shape index: {}]   ;;  %s767_s2 = inlined_call_operand.vmem [shape: f32[1,256], index: 2, kind: input, shape index: {}]   ;;  %s768_s3 = inlined_call_operand.hbm [shape: bf16[256,128], index: 3, kind: input, shape index: {}]   ;;  %s769_s4 = inlined_call_operand.vmem [shape: f32[1,128], index: 4, kind: input, shape index: {}]   ;;  %s770_s5 = inlined_call_operand.hbm [shape: f32[32,128], index: 5, kind: output, shape index: {}]  }
   0x1   :  { %11 = vsyncpa [#allocation6], 0 }
   0x2   :  { %12 = vsyncpa [#allocation4], 0  ;;  %s666_s18 = smov [#allocation5]   ;;  %s572_s22 = scalar_lea.hbm %s766_s1, 2048 }
   0x3   :  { %s30_s19 = sshll.u32 %s666_s18, 4  ;;  %p573_p0 = scmp.ne.s32.totalorder %s766_s1, %s572_s22  ;;  %s31_s19 = int_to_ptr.vmem [resolvable:$true] %s30_s19 }
   0x4   :  { %p576_p1 = scmp.lt.u32.totalorder %s572_s22, %s766_s1 }
   0x6   :  { %p578_p2 = pnand %p576_p1, %p573_p0 }
   0x8   :  { %581 = shalt.err (!%p578_p2)
}
   0x9   :  { %s582_s27 = scalar_lea.vmem %s31_s19, 2048  ;;  %p587_p4 = scmp.lt.s32.totalorder %s31_s19, %s31_s19 }
   0xa   :  { %p583_p3 = scmp.ne.s32.totalorder %s31_s19, %s582_s27  ;;  %p588_p5 = scmp.lt.s32.totalorder %s582_s27, %s582_s27 }
   0xc   :  { %p589_p6 = por %p588_p5, %p587_p4 }
   0xe   :  { %p590_p7 = pnand %p589_p6, %p583_p3 }
  0x10   :  { %593 = shalt.err (!%p590_p7)
}
  0x11   :  { %s667_s28 = smov 128   ;;  %s668_s29 = smov 8  }
  0x12   :  { %36 = dma.hbm_to_vmem [thread:$0]  %s766_s1, 2048, %s31_s19, [#allocation6], %s667_s28, %s667_s28, %s668_s29  }
  0x13   :  { %s669_s7 = smov [#allocation2]   ;;  %s594_s11 = scalar_lea.hbm %s765_s0, 256 }
  0x14   :  { %s18_s8 = sshll.u32 %s669_s7, 4  ;;  %p595_p8 = scmp.ne.s32.totalorder %s765_s0, %s594_s11  ;;  %s19_s8 = int_to_ptr.vmem [resolvable:$true] %s18_s8 }
  0x15   :  { %p598_p9 = scmp.lt.u32.totalorder %s594_s11, %s765_s0 }
  0x17   :  { %p600_p10 = pnand %p598_p9, %p595_p8 }
  0x19   :  { %603 = shalt.err (!%p600_p10)
}
  0x1a   :  { %s604_s16 = scalar_lea.vmem %s19_s8, 256  ;;  %p609_p12 = scmp.lt.s32.totalorder %s19_s8, %s19_s8 }
  0x1b   :  { %p605_p11 = scmp.ne.s32.totalorder %s19_s8, %s604_s16  ;;  %p610_p13 = scmp.lt.s32.totalorder %s604_s16, %s604_s16 }
  0x1d   :  { %p611_p0 = por %p610_p13, %p609_p12 }
  0x1f   :  { %p612_p1 = pnand %p611_p0, %p605_p11 }
  0x21   :  { %615 = shalt.err (!%p612_p1)
}
  0x22   :  { %s670_s1 = smov 64   ;;  %s671_s17 = smov 4  }
  0x23   :  { %24 = dma.hbm_to_vmem [thread:$0]  %s765_s0, 256, %s19_s8, [#allocation3], %s670_s1, %s670_s1, %s671_s17  }
  0x24   :  { %s672_s20 = smov [#allocation7]   ;;  %s616_s24 = scalar_lea.hbm %s768_s3, 2048 }
  0x25   :  { %s44_s21 = sshll.u32 %s672_s20, 4  ;;  %p617_p2 = scmp.ne.s32.totalorder %s768_s3, %s616_s24  ;;  %s45_s21 = int_to_ptr.vmem [resolvable:$true] %s44_s21 }
  0x26   :  { %p620_p3 = scmp.lt.u32.totalorder %s616_s24, %s768_s3 }
  0x28   :  { %p622_p4 = pnand %p620_p3, %p617_p2 }
  0x2a   :  { %625 = shalt.err (!%p622_p4)
}
  0x2b   :  { %s626_s6 = scalar_lea.vmem %s45_s21, 2048  ;;  %p631_p6 = scmp.lt.s32.totalorder %s45_s21, %s45_s21 }
  0x2c   :  { %p627_p5 = scmp.ne.s32.totalorder %s45_s21, %s626_s6  ;;  %p632_p7 = scmp.lt.s32.totalorder %s626_s6, %s626_s6 }
  0x2e   :  { %p633_p8 = por %p632_p7, %p631_p6 }
  0x30   :  { %p634_p9 = pnand %p633_p8, %p627_p5 }
  0x32   :  { %637 = shalt.err (!%p634_p9)
}
  0x33   :  { %50 = dma.hbm_to_vmem [thread:$0]  %s768_s3, 2048, %s45_s21, [#allocation6], %s670_s1, %s670_s1, %s671_s17  }
  0x34   :  { %660 = dma.done.wait [#allocation3], 256  }
  0x35   :  { %661 = vsyncadd [#allocation3], 4294967040 }
  0x36   :  { %662 = dma.done.wait [#allocation6], 4096  }
  0x37   :  { %663 = vsyncadd [#allocation6], 4294963200  ;;  %v673_v0 = vmov 0   ;;  %v530_v1 = vld [vmem:[#allocation5 + $0x4] ss:$8 sps:$4 sm:$0xff]   ;;  %v560_v16 = vld [vmem:[#allocation7 + $0x50] sm:$0xff]   ;;  %v85_v35 = vlaneseq }
  0x38   :  { %219 = vmatprep.mubr.bf16.mxu0 %v673_v0  ;;  %v532_v2 = vld [vmem:[#allocation5] ss:$8 sps:$4 sm:$0xff]   ;;  %187 = vmatprep.subr.bf16.mxu0 %v530_v1  ;;  %v533_v3 = vld [vmem:[#allocation5 + $0x14] ss:$8 sps:$4 sm:$0xff]   ;;  %v535_v4 = vld [vmem:[#allocation5 + $0x10] ss:$8 sps:$4 sm:$0xff]  }
  0x39   :  { %188 = vmatpush1.bf16.msra.mxu0 %v532_v2  ;;  %v536_v5 = vld [vmem:[#allocation5 + $0x24] ss:$8 sps:$4 sm:$0xff]   ;;  %v538_v6 = vld [vmem:[#allocation5 + $0x20] ss:$8 sps:$4 sm:$0xff]   ;;  %v539_v7 = vld [vmem:[#allocation5 + $0x34] ss:$8 sps:$4 sm:$0xff]  }
  0x3a   :  { %189 = vmatprep.subr.bf16.mxu0 %v533_v3  ;;  %v541_v8 = vld [vmem:[#allocation5 + $0x30] ss:$8 sps:$4 sm:$0xff]   ;;  %v542_v9 = vld [vmem:[#allocation5 + $0x44] ss:$8 sps:$4 sm:$0xff]   ;;  %v544_v10 = vld [vmem:[#allocation5 + $0x40] ss:$8 sps:$4 sm:$0xff]  }
  0x3b   :  { %v556_v11 = vld [vmem:[#allocation7 + $0x40] sm:$0xff]   ;;  %v545_v12 = vld [vmem:[#allocation5 + $0x54] ss:$8 sps:$4 sm:$0xff]   ;;  %v558_v14 = vld [vmem:[#allocation7 + $0x48] sm:$0xff]   ;;  %v86_v36 = vshrl.u32 %v85_v35, 7  ;;  %s674_s10 = smov [#allocation8]  }
  0x3c   :  { %v557_v13 = vld [vmem:[#allocation7] sm:$0xff]   ;;  %493 = vmatprep.subr.bf16.mxu1 %v556_v11  ;;  %v559_v15 = vld [vmem:[#allocation7 + $0x8] sm:$0xff]   ;;  %v547_v17 = vld [vmem:[#allocation5 + $0x50] ss:$8 sps:$4 sm:$0xff]   ;;  %s445_s11 = sshll.u32 %s674_s10, 4  ;;  %s446_s11 = int_to_ptr.vmem [resolvable:$true] %s445_s11 }
  0x3d   :  { %190 = vmatpush1.bf16.msra.mxu0 %v535_v4  ;;  %494 = vmatpush3.bf16.msra.mxu1 %v557_v13  ;;  %v548_v18 = vld [vmem:[#allocation5 + $0x64] ss:$8 sps:$4 sm:$0xff]   ;;  %v561_v19 = vld [vmem:[#allocation7 + $0x10] sm:$0xff]   ;;  %v550_v20 = vld [vmem:[#allocation5 + $0x60] ss:$8 sps:$4 sm:$0xff]   ;;  %v87_v37 = vsub.s32 0, %v86_v36  ;;  %p643_p11 = scmp.lt.s32.totalorder %s446_s11, %s446_s11 }
  0x3e   :  { %191 = vmatprep.subr.bf16.mxu0 %v536_v5  ;;  %495 = vmatprep.subr.bf16.mxu1 %v558_v14  ;;  %v562_v21 = vld [vmem:[#allocation7 + $0x58] sm:$0xff]   ;;  %v564_v24 = vld [vmem:[#allocation7 + $0x60] sm:$0xff]   ;;  %v566_v27 = vld [vmem:[#allocation7 + $0x68] sm:$0xff]   ;;  %v91_v39 = vsub.s32 1, %v86_v36 }
  0x3f   :  { %v551_v22 = vld [vmem:[#allocation5 + $0x74] ss:$8 sps:$4 sm:$0xff]   ;;  %v553_v25 = vld [vmem:[#allocation5 + $0x70] ss:$8 sps:$4 sm:$0xff]   ;;  %v565_v26 = vld [vmem:[#allocation7 + $0x20] sm:$0xff]  }
  0x40   :  { %v563_v23 = vld [vmem:[#allocation7 + $0x18] sm:$0xff]   ;;  %v554_v28 = vld [vmem:[#allocation2] sm:$0xff]   ;;  %v567_v30 = vld [vmem:[#allocation7 + $0x28] sm:$0xff]  }
  0x41   :  { %192 = vmatpush1.bf16.msra.mxu0 %v538_v6  ;;  %496 = vmatpush3.bf16.msra.mxu1 %v559_v15  ;;  %v555_v29 = vld [vmem:[#allocation2 + $0x8] sm:$0xff]   ;;  %v568_v31 = vld [vmem:[#allocation7 + $0x70] sm:$0xff]  }
  0x42   :  { %193 = vmatprep.subr.bf16.mxu0 %v539_v7  ;;  %497 = vmatprep.subr.bf16.mxu1 %v560_v16  ;;  %v569_v32 = vld [vmem:[#allocation7 + $0x30] sm:$0xff]   ;;  %v570_v33 = vld [vmem:[#allocation7 + $0x78] sm:$0xff]  }
  0x43   :  { %v571_v34 = vld [vmem:[#allocation7 + $0x38] sm:$0xff]   ;;  %v83_v38 = vld [vmem:[%s767_s2] sm:$0x3] }
  0x44   :  { %v88_v40 = vrot.slane %v83_v38, %v87_v37  ;;  %v92_v41 = vrot.slane %v83_v38, %v91_v39  ;;  %v476_v7 = vld [vmem:[%s769_s4] ss:$0 sm:$0xff]  ;;  %s638_s4 = scalar_lea.vmem %s446_s11, 512 }
  0x45   :  { %194 = vmatpush1.bf16.msra.mxu0 %v541_v8  ;;  %498 = vmatpush3.bf16.msra.mxu1 %v561_v19  ;;  %p639_p10 = scmp.ne.s32.totalorder %s446_s11, %s638_s4  ;;  %p644_p12 = scmp.lt.s32.totalorder %s638_s4, %s638_s4 }
  0x46   :  { %195 = vmatprep.subr.bf16.mxu0 %v542_v9  ;;  %499 = vmatprep.subr.bf16.mxu1 %v562_v21 }
  0x47   :  { %p645_p13 = por %p644_p12, %p643_p11 }
  0x49   :  { %196 = vmatpush1.bf16.msra.mxu0 %v544_v10  ;;  %500 = vmatpush3.bf16.msra.mxu1 %v563_v23  ;;  %p646_p0 = pnand %p645_p13, %p639_p10 }
  0x4a   :  { %197 = vmatprep.subr.bf16.mxu0 %v545_v12  ;;  %501 = vmatprep.subr.bf16.mxu1 %v564_v24 }
  0x4d   :  { %198 = vmatpush1.bf16.msra.mxu0 %v547_v17  ;;  %502 = vmatpush3.bf16.msra.mxu1 %v565_v26 }
  0x4e   :  { %199 = vmatprep.subr.bf16.mxu0 %v548_v18  ;;  %503 = vmatprep.subr.bf16.mxu1 %v566_v27 }
  0x51   :  { %200 = vmatpush1.bf16.msra.mxu0 %v550_v20  ;;  %504 = vmatpush3.bf16.msra.mxu1 %v567_v30 }
  0x52   :  { %201 = vmatprep.subr.bf16.mxu0 %v551_v22  ;;  %505 = vmatprep.subr.bf16.mxu1 %v568_v31 }
  0x55   :  { %202 = vmatpush1.bf16.msra.mxu0 %v553_v25  ;;  %506 = vmatpush3.bf16.msra.mxu1 %v569_v32 }
  0x56   :  { %507 = vmatprep.subr.bf16.mxu1 %v570_v33 }
  0x58   :  { %220 = vmatmul.mubr.bf16.vlgmr.msra.gmra.mrb[0].mxu0 %v554_v28 }
  0x59   :  { %229 = vmatprep.mubr.bf16.mxu0 %v673_v0  ;;  %508 = vmatpush3.bf16.msra.mxu1 %v571_v34 }
  0x60   :  { %230 = vmatmul.mubr.bf16.gmra.mrb[4].mxu0 %v555_v29 }
 0x12b   :  { %v221_v42 = vpop.f32.mrb[0].mxu0 }
 0x12c   :  { %v222_v43 = vadd.f32 %v221_v42, %v88_v40  ;;  %v223_v44 = vpop.f32.mrb[1].mxu0 }
 0x12d   :  { %v224_v45 = vadd.f32 %v223_v44, %v92_v41  ;;  %v225_v46 = vpop.f32.mrb[2].mxu0 }
 0x12e   :  { %v226_v47 = vadd.f32 %v225_v46, %v88_v40  ;;  %v227_v48 = vpop.f32.mrb[3].mxu0  ;;  %v240_v50 = vmax.f32 %v222_v43, 0.0 }
 0x12f   :  { %v228_v49 = vadd.f32 %v227_v48, %v92_v41  ;;  %v241_v52 = vmax.f32 %v224_v45, 0.0 }
 0x130   :  { %v242_v51 = vmax.f32 %v226_v47, 0.0 }
 0x131   :  { %v243_v53 = vmax.f32 %v228_v49, 0.0 }
 0x132   :  { %v248_v54 = vpack.c.bf16 %v242_v51, %v240_v50 }
 0x133   :  { %v231_v55 = vpop.f32.mrb[4].mxu0  ;;  %v249_v56 = vpack.c.bf16 %v243_v53, %v241_v52 }
 0x134   :  { %v232_v57 = vadd.f32 %v231_v55, %v88_v40  ;;  %v233_v58 = vpop.f32.mrb[5].mxu0 }
 0x135   :  { %v234_v59 = vadd.f32 %v233_v58, %v92_v41  ;;  %v235_v60 = vpop.f32.mrb[6].mxu0  ;;  %419 = vmatprep.mubr.bf16.mxu1 %v249_v56 }
 0x136   :  { %v236_v61 = vadd.f32 %v235_v60, %v88_v40  ;;  %v237_v62 = vpop.f32.mrb[7].mxu0  ;;  %420 = vmatmul.mubr.bf16.vlgmr.msra.gmra.mrb[0].mxu1 %v248_v54  ;;  %v244_v0 = vmax.f32 %v232_v57, 0.0 }
 0x137   :  { %v238_v63 = vadd.f32 %v237_v62, %v92_v41  ;;  %v245_v2 = vmax.f32 %v234_v59, 0.0 }
 0x138   :  { %v246_v1 = vmax.f32 %v236_v61, 0.0 }
 0x139   :  { %v247_v3 = vmax.f32 %v238_v63, 0.0 }
 0x13a   :  { %v250_v4 = vpack.c.bf16 %v246_v1, %v244_v0 }
 0x13b   :  { %v251_v5 = vpack.c.bf16 %v247_v3, %v245_v2 }
 0x13d   :  { %427 = vmatprep.mubr.bf16.mxu1 %v251_v5 }
 0x13e   :  { %428 = vmatmul.mubr.bf16.gmra.mrb[4].mxu1 %v250_v4 }
 0x209   :  { %v509_v6 = vpop.f32.mrb[0].mxu1 }
 0x20a   :  { %v510_v8 = vpop.f32.mrb[1].mxu1 }
 0x20b   :  { %v511_v9 = vadd.f32 %v510_v8, %v509_v6  ;;  %v512_v10 = vpop.f32.mrb[2].mxu1 }
 0x20c   :  { %v513_v11 = vpop.f32.mrb[3].mxu1 }
 0x20d   :  { %v422_v12 = vadd.f32 %v511_v9, %v476_v7  ;;  %v514_v13 = vadd.f32 %v513_v11, %v512_v10 }
 0x20f   :  { %436 = vst [vmem:[#allocation8] sm:$0xff] %v422_v12  ;;  %v425_v14 = vadd.f32 %v514_v13, %v476_v7 }
 0x211   :  { %437 = vst [vmem:[#allocation8 + $0x8] sm:$0xff] %v425_v14  ;;  %v515_v15 = vpop.f32.mrb[4].mxu1 }
 0x212   :  { %v516_v16 = vpop.f32.mrb[5].mxu1 }
 0x213   :  { %v517_v17 = vadd.f32 %v516_v16, %v515_v15  ;;  %v518_v18 = vpop.f32.mrb[6].mxu1 }
 0x214   :  { %v519_v19 = vpop.f32.mrb[7].mxu1 }
 0x215   :  { %v430_v20 = vadd.f32 %v517_v17, %v476_v7  ;;  %v520_v21 = vadd.f32 %v519_v19, %v518_v18 }
 0x217   :  { %438 = vst [vmem:[#allocation8 + $0x10] sm:$0xff] %v430_v20  ;;  %v433_v22 = vadd.f32 %v520_v21, %v476_v7 }
 0x219   :  { %439 = vst [vmem:[#allocation8 + $0x18] sm:$0xff] %v433_v22 }
 0x21a   :  { %649 = shalt.err (!%p646_p0)
}
 0x21b   :  { %s650_s14 = scalar_lea.hbm %s770_s5, 512 }
 0x21c   :  { %p651_p1 = scmp.ne.s32.totalorder %s770_s5, %s650_s14  ;;  %p654_p2 = scmp.lt.u32.totalorder %s650_s14, %s770_s5 }
 0x21e   :  { %p656_p3 = pnand %p654_p2, %p651_p1 }
 0x220   :  { %659 = shalt.err (!%p656_p3)
}
 0x221   :  { %451 = dma.vmem_to_hbm [thread:$0]  %s446_s11, 512, %s770_s5, [#allocation4], %s667_s28, %s667_s28, %s668_s29  }
 0x222   :  { %664 = dma.done.wait [#allocation4], 512  }
 0x223   :  { %665 = vsyncadd [#allocation4], 4294966784 }
 0x224   :  { %455 = vsyncpa [#allocation3], 1 }
 0x225   :  { %456 = vsyncpa [#allocation6], 1 }
 0x226   :  { %457 = vsyncpa [#allocation4], 1 }

</bundles_post_ra>
